<compile_context>
chip_gen: v6e
topology: v6e:2x2x1
jax: 0.10.0
libtpu: 0.0.40
codegen_flags: <defaults>
</compile_context>

<pallas_src>
import functools
import math

import jax
import jax.numpy as jnp
from jax.experimental import pallas as pl
from jax.experimental.pallas import tpu as pltpu


_TARGET_ROWS = 256   # aim for G*Lq >= 256 rows of Q per grid step (v6e/v7x MXU width)
_MAX_BLOCK_K = 512   # Lk reduction tile (multiple of 128 -> legal mask minor dim)


def _cdiv(a, b):
    return (a + b - 1) // b


def _sdpa_kernel(q_ref, k_ref, v_ref, m_ref, o_ref,
                 m_sc, l_sc, acc_sc, *, scale, lk_valid, block_k):
    """One grid step: G heads x full Lq x one Lk tile, online-softmax update."""
    kv = pl.program_id(1)

    @pl.when(kv == 0)
    def _():
        m_sc[...] = jnp.full(m_sc.shape, -jnp.inf, dtype=jnp.float32)
        l_sc[...] = jnp.zeros(l_sc.shape, dtype=jnp.float32)
        acc_sc[...] = jnp.zeros(acc_sc.shape, dtype=jnp.float32)

    # Fold 1/sqrt(d_k) into Q; keep native dtype so bf16 inputs hit the fast
    # MXU path.  f32 accumulation via preferred_element_type.
    q = q_ref[...] * scale                                   # (G, Lq, Dk)
    s = jnp.einsum("gqd,gkd->gqk", q, k_ref[...],            # no explicit K^T
                   preferred_element_type=jnp.float32)        # (G, Lq, Bk) f32

    # torch masked_fill_(attn_mask, -1e9): True == masked out (exact set).
    s = jnp.where(m_ref[...] != 0, jnp.float32(-1e9), s)

    # Kill K-padding columns exactly (only traced when Lk % block_k != 0).
    if lk_valid is not None:
        kpos = kv * block_k + jax.lax.broadcasted_iota(jnp.int32, s.shape, 2)
        s = jnp.where(kpos >= lk_valid, -jnp.inf, s)

    # Online (flash-style) softmax across the Lk tiles.
    m_prev = m_sc[...]
    m_new = jnp.maximum(m_prev, jnp.max(s, axis=-1, keepdims=True))
    alpha = jnp.exp(m_prev - m_new)
    p = jnp.exp(s - m_new)
    l_sc[...] = alpha * l_sc[...] + jnp.sum(p, axis=-1, keepdims=True)
    acc_sc[...] = alpha * acc_sc[...] + jnp.einsum(
        "gqk,gkd->gqd", p.astype(v_ref.dtype), v_ref[...],
        preferred_element_type=jnp.float32)
    m_sc[...] = m_new

    @pl.when(kv == pl.num_programs(1) - 1)
    def _():
        l = l_sc[...]
        inv = pl.reciprocal(l, approx=True)   # EUP seed (free bundle slot)
        inv = inv * (2.0 - l * inv)           # one Newton step -> ~f32 accuracy
        o_ref[...] = (acc_sc[...] * inv).astype(o_ref.dtype)


@jax.jit
def scaled_dot_product_de_attention(Q, K, V, attn_mask):
    """Q:[B,H,Lq,Dk] K:[B,H,Lk,Dk] V:[B,H,Lk,Dv] attn_mask(bool):[B,H,Lq,Lk]."""
    B, H, Lq, Dk = Q.shape
    Lk = K.shape[2]
    Dv = V.shape[3]
    BH = B * H

    q = Q.reshape(BH, Lq, Dk)
    k = K.reshape(BH, Lk, Dk)
    v = V.reshape(BH, Lk, Dv)
    # int8 mask: 4x less DMA / VMEM than the old int32 path.
    m = attn_mask.reshape(BH, Lq, Lk).astype(jnp.int8)

    # --- how many (batch, head) slices per grid step -------------------------
    G = max(1, min(BH, _cdiv(_TARGET_ROWS, Lq)))
    if BH >= 2:
        # keep >= 2 steps on the parallel axis (v7x has 2 TCs / megacore).
        G = min(G, _cdiv(BH, 2))
    nbh = _cdiv(BH, G)
    BHp = nbh * G

    # --- Lk reduction tile (online softmax over kv blocks) -------------------
    if Lk <= _MAX_BLOCK_K:
        block_k, Lkp = Lk, Lk
    else:
        block_k = _MAX_BLOCK_K
        Lkp = _cdiv(Lk, block_k) * block_k
    nkv = Lkp // block_k

    # --- padding (no-op for aligned shapes, e.g. the test below) -------------
    if BHp != BH:
        pad = [(0, BHp - BH), (0, 0), (0, 0)]
        q = jnp.pad(q, pad)
        k = jnp.pad(k, pad)
        v = jnp.pad(v, pad)
        m = jnp.pad(m, pad)
    if Lkp != Lk:
        k = jnp.pad(k, [(0, 0), (0, Lkp - Lk), (0, 0)])
        v = jnp.pad(v, [(0, 0), (0, Lkp - Lk), (0, 0)])
        m = jnp.pad(m, [(0, 0), (0, 0), (0, Lkp - Lk)], constant_values=1)

    scale = 1.0 / math.sqrt(Dk)
    kernel = functools.partial(
        _sdpa_kernel,
        scale=scale,
        lk_valid=(Lk if Lkp != Lk else None),
        block_k=block_k,
    )

    out = pl.pallas_call(
        kernel,
        out_shape=jax.ShapeDtypeStruct((BHp, Lq, Dv), Q.dtype),
        grid_spec=pltpu.PrefetchScalarGridSpec(
            num_scalar_prefetch=0,
            grid=(nbh, nkv),                                  # (parallel, reduce)
            in_specs=[
                pl.BlockSpec((G, Lq, Dk), lambda i, j: (i, 0, 0)),       # Q
                pl.BlockSpec((G, block_k, Dk), lambda i, j: (i, j, 0)),  # K
                pl.BlockSpec((G, block_k, Dv), lambda i, j: (i, j, 0)),  # V
                pl.BlockSpec((G, Lq, block_k), lambda i, j: (i, 0, j)),  # mask
            ],
            out_specs=pl.BlockSpec((G, Lq, Dv), lambda i, j: (i, 0, 0)),
            scratch_shapes=[
                pltpu.VMEM((G, Lq, 1), jnp.float32),   # running max
                pltpu.VMEM((G, Lq, 1), jnp.float32),   # running denom
                pltpu.VMEM((G, Lq, Dv), jnp.float32),  # running context acc
            ],
        ),
        compiler_params=pltpu.CompilerParams(
            dimension_semantics=("parallel", "arbitrary"),
            vmem_limit_bytes=64 * 1024 * 1024,
        ),
    )(q, k, v, m)

    if BHp != BH:
        out = out[:BH]
    return out.reshape(B, H, Lq, Dv)


def _reference(Q, K, V, attn_mask):
    d_k = Q.shape[-1]
    scores = jnp.einsum("bhqd,bhkd->bhqk", Q, K,
                        precision=jax.lax.Precision.HIGHEST)
    scores = scores / jnp.sqrt(jnp.float32(d_k))
    scores = jnp.where(attn_mask, jnp.float32(-1e9), scores)
    attn = jax.nn.softmax(scores, axis=-1)
    return jnp.einsum("bhqk,bhkd->bhqd", attn, V,
                      precision=jax.lax.Precision.HIGHEST)


if __name__ == "__main__":
    key = jax.random.PRNGKey(0)
    k_q, k_k, k_v, k_m = jax.random.split(key, 4)

    B, H, Lq, Lk, Dk, Dv = 2, 4, 8, 8, 32, 32
    Q = jax.random.normal(k_q, (B, H, Lq, Dk), dtype=jnp.float32)
    K = jax.random.normal(k_k, (B, H, Lk, Dk), dtype=jnp.float32)
    V = jax.random.normal(k_v, (B, H, Lk, Dv), dtype=jnp.float32)
    # random boolean mask (True = masked out); keep >=1 unmasked key per row
    attn_mask = jax.random.bernoulli(k_m, p=0.3, shape=(B, H, Lq, Lk))
    attn_mask = attn_mask.at[..., 0].set(False)

    out = scaled_dot_product_de_attention(Q, K, V, attn_mask)
    jax.block_until_ready(out)

    ref = _reference(Q, K, V, attn_mask)
    assert out.shape == (B, H, Lq, Dv)
    assert jnp.allclose(out, ref, atol=1e-3, rtol=1e-3), "mismatch vs reference"

    print("KERNEL_OK")
</pallas_src>

<mosaic_0001>
module attributes {stable_mosaic.version = 11 : i64} {
  func.func @_sdpa_kernel(%arg0: i32, %arg1: i32, %arg2: memref<4x8x32xf32, #tpu.memory_space<vmem>>, %arg3: memref<4x8x32xf32, #tpu.memory_space<vmem>>, %arg4: memref<4x8x32xf32, #tpu.memory_space<vmem>>, %arg5: memref<4x8x8xi8, #tpu.memory_space<vmem>>, %arg6: memref<4x8x32xf32, #tpu.memory_space<vmem>>, %arg7: memref<4x8x1xf32, #tpu.memory_space<vmem>>, %arg8: memref<4x8x1xf32, #tpu.memory_space<vmem>>, %arg9: memref<4x8x32xf32, #tpu.memory_space<vmem>>) attributes {dimension_semantics = [#tpu.dimension_semantics<parallel>, #tpu.dimension_semantics<arbitrary>], iteration_bounds = array<i64: 2, 1>, scalar_prefetch = 0 : i64, scratch_operands = 3 : i64, tpu.core_type = #tpu.core_type<tc>, window_params = [{transform_indices = @transform_0, window_bounds = array<i64: 4, 8, 32>}, {transform_indices = @transform_1, window_bounds = array<i64: 4, 8, 32>}, {transform_indices = @transform_2, window_bounds = array<i64: 4, 8, 32>}, {transform_indices = @transform_3, window_bounds = array<i64: 4, 8, 8>}, {transform_indices = @transform_4, window_bounds = array<i64: 4, 8, 32>}]} {
    %c0_i32 = arith.constant 0 : i32
    %0 = arith.cmpi eq, %arg1, %c0_i32 : i32
    %1 = arith.extui %0 : i1 to i32
    %c0_i32_0 = arith.constant 0 : i32
    %2 = arith.cmpi ne, %1, %c0_i32_0 : i32
    scf.if %2 {
      %cst_37 = arith.constant 0xFF800000 : f32
      %39 = vector.broadcast %cst_37 : f32 to vector<4x8x1xf32>
      %c0_38 = arith.constant 0 : index
      %c0_39 = arith.constant 0 : index
      %c0_40 = arith.constant 0 : index
      %40 = vector.load %arg7[%c0_38, %c0_39, %c0_40] : memref<4x8x1xf32, #tpu.memory_space<vmem>>, vector<4x8x1xf32>
      tpu.vector_store %arg7[%c0_38, %c0_39, %c0_40], %39 {strides = array<i32>} : memref<4x8x1xf32, #tpu.memory_space<vmem>>, vector<4x8x1xf32>,
      %cst_41 = arith.constant 0.000000e+00 : f32
      %41 = vector.broadcast %cst_41 : f32 to vector<4x8x1xf32>
      %c0_42 = arith.constant 0 : index
      %c0_43 = arith.constant 0 : index
      %c0_44 = arith.constant 0 : index
      %42 = vector.load %arg8[%c0_42, %c0_43, %c0_44] : memref<4x8x1xf32, #tpu.memory_space<vmem>>, vector<4x8x1xf32>
      tpu.vector_store %arg8[%c0_42, %c0_43, %c0_44], %41 {strides = array<i32>} : memref<4x8x1xf32, #tpu.memory_space<vmem>>, vector<4x8x1xf32>,
      %cst_45 = arith.constant 0.000000e+00 : f32
      %43 = vector.broadcast %cst_45 : f32 to vector<4x8x32xf32>
      %c0_46 = arith.constant 0 : index
      %c0_47 = arith.constant 0 : index
      %c0_48 = arith.constant 0 : index
      %44 = vector.load %arg9[%c0_46, %c0_47, %c0_48] : memref<4x8x32xf32, #tpu.memory_space<vmem>>, vector<4x8x32xf32>
      tpu.vector_store %arg9[%c0_46, %c0_47, %c0_48], %43 {strides = array<i32>} : memref<4x8x32xf32, #tpu.memory_space<vmem>>, vector<4x8x32xf32>,
    } else {
    }
    %c0 = arith.constant 0 : index
    %c0_1 = arith.constant 0 : index
    %c0_2 = arith.constant 0 : index
    %3 = vector.load %arg2[%c0, %c0_1, %c0_2] : memref<4x8x32xf32, #tpu.memory_space<vmem>>, vector<4x8x32xf32>
    %cst = arith.constant 0.176776692 : f32
    %4 = vector.broadcast %cst : f32 to vector<4x8x32xf32>
    %5 = arith.mulf %3, %4 : vector<4x8x32xf32>
    %c0_3 = arith.constant 0 : index
    %c0_4 = arith.constant 0 : index
    %c0_5 = arith.constant 0 : index
    %6 = vector.load %arg3[%c0_3, %c0_4, %c0_5] : memref<4x8x32xf32, #tpu.memory_space<vmem>>, vector<4x8x32xf32>
    "tpu.trace_start"() <{level = 10 : i32, message = "gqd,gkd->gqk"}> : () -> ()
    %cst_6 = arith.constant dense<0.000000e+00> : vector<4x8x8xf32>
    %7 = tpu.matmul %5, %6, %cst_6 {dimension_numbers = #tpu.dot_dimension_numbers<[2], [2], [1], [1], [0, 0, 0, 1, 1, 1], [0], [0]>} : vector<4x8x32xf32>, vector<4x8x32xf32>, vector<4x8x8xf32> -> vector<4x8x8xf32>
    "tpu.trace_stop"() : () -> ()
    %c0_7 = arith.constant 0 : index
    %c0_8 = arith.constant 0 : index
    %c0_9 = arith.constant 0 : index
    %8 = vector.load %arg5[%c0_7, %c0_8, %c0_9] : memref<4x8x8xi8, #tpu.memory_space<vmem>>, vector<4x8x8xi8>
    %c0_i8 = arith.constant 0 : i8
    %9 = vector.broadcast %c0_i8 : i8 to vector<4x8x8xi8>
    %10 = arith.cmpi ne, %8, %9 : vector<4x8x8xi8>
    %cst_10 = arith.constant -1.000000e+09 : f32
    %11 = vector.broadcast %cst_10 : f32 to vector<4x8x8xf32>
    %12 = arith.select %10, %11, %7 : vector<4x8x8xi1>, vector<4x8x8xf32>
    %c0_11 = arith.constant 0 : index
    %c0_12 = arith.constant 0 : index
    %c0_13 = arith.constant 0 : index
    %13 = vector.load %arg7[%c0_11, %c0_12, %c0_13] : memref<4x8x1xf32, #tpu.memory_space<vmem>>, vector<4x8x1xf32>
    %cst_14 = arith.constant dense<0xFF800000> : vector<4x8xf32>
    %14 = vector.multi_reduction <maximumf>, %12, %cst_14 [2] : vector<4x8x8xf32> to vector<4x8xf32>
    %15 = vector.shape_cast %14 : vector<4x8xf32> to vector<4x8x1xf32>
    %16 = arith.maximumf %13, %15 : vector<4x8x1xf32>
    %17 = arith.subf %13, %16 : vector<4x8x1xf32>
    %18 = math.exp %17 : vector<4x8x1xf32>
    %19 = vector.broadcast %16 : vector<4x8x1xf32> to vector<4x8x8xf32>
    %20 = arith.subf %12, %19 : vector<4x8x8xf32>
    %21 = math.exp %20 : vector<4x8x8xf32>
    %c0_15 = arith.constant 0 : index
    %c0_16 = arith.constant 0 : index
    %c0_17 = arith.constant 0 : index
    %22 = vector.load %arg8[%c0_15, %c0_16, %c0_17] : memref<4x8x1xf32, #tpu.memory_space<vmem>>, vector<4x8x1xf32>
    %23 = arith.mulf %18, %22 : vector<4x8x1xf32>
    %cst_18 = arith.constant dense<0.000000e+00> : vector<4x8xf32>
    %24 = vector.multi_reduction <add>, %21, %cst_18 [2] : vector<4x8x8xf32> to vector<4x8xf32>
    %25 = vector.shape_cast %24 : vector<4x8xf32> to vector<4x8x1xf32>
    %26 = arith.addf %23, %25 : vector<4x8x1xf32>
    %c0_19 = arith.constant 0 : index
    %c0_20 = arith.constant 0 : index
    %c0_21 = arith.constant 0 : index
    %27 = vector.load %arg8[%c0_19, %c0_20, %c0_21] : memref<4x8x1xf32, #tpu.memory_space<vmem>>, vector<4x8x1xf32>
    tpu.vector_store %arg8[%c0_19, %c0_20, %c0_21], %26 {strides = array<i32>} : memref<4x8x1xf32, #tpu.memory_space<vmem>>, vector<4x8x1xf32>,
    %c0_22 = arith.constant 0 : index
    %c0_23 = arith.constant 0 : index
    %c0_24 = arith.constant 0 : index
    %28 = vector.load %arg9[%c0_22, %c0_23, %c0_24] : memref<4x8x32xf32, #tpu.memory_space<vmem>>, vector<4x8x32xf32>
    %29 = vector.broadcast %18 : vector<4x8x1xf32> to vector<4x8x32xf32>
    %30 = arith.mulf %29, %28 : vector<4x8x32xf32>
    %c0_25 = arith.constant 0 : index
    %c0_26 = arith.constant 0 : index
    %c0_27 = arith.constant 0 : index
    %31 = vector.load %arg4[%c0_25, %c0_26, %c0_27] : memref<4x8x32xf32, #tpu.memory_space<vmem>>, vector<4x8x32xf32>
    "tpu.trace_start"() <{level = 10 : i32, message = "gqk,gkd->gqd"}> : () -> ()
    %cst_28 = arith.constant dense<0.000000e+00> : vector<4x8x32xf32>
    %32 = tpu.matmul %21, %31, %cst_28 {dimension_numbers = #tpu.dot_dimension_numbers<[2], [1], [1], [2], [0, 0, 0, 1, 1, 2], [0], [0]>} : vector<4x8x8xf32>, vector<4x8x32xf32>, vector<4x8x32xf32> -> vector<4x8x32xf32>
    "tpu.trace_stop"() : () -> ()
    %33 = arith.addf %30, %32 : vector<4x8x32xf32>
    %c0_29 = arith.constant 0 : index
    %c0_30 = arith.constant 0 : index
    %c0_31 = arith.constant 0 : index
    %34 = vector.load %arg9[%c0_29, %c0_30, %c0_31] : memref<4x8x32xf32, #tpu.memory_space<vmem>>, vector<4x8x32xf32>
    tpu.vector_store %arg9[%c0_29, %c0_30, %c0_31], %33 {strides = array<i32>} : memref<4x8x32xf32, #tpu.memory_space<vmem>>, vector<4x8x32xf32>,
    %c0_32 = arith.constant 0 : index
    %c0_33 = arith.constant 0 : index
    %c0_34 = arith.constant 0 : index
    %35 = vector.load %arg7[%c0_32, %c0_33, %c0_34] : memref<4x8x1xf32, #tpu.memory_space<vmem>>, vector<4x8x1xf32>
    tpu.vector_store %arg7[%c0_32, %c0_33, %c0_34], %16 {strides = array<i32>} : memref<4x8x1xf32, #tpu.memory_space<vmem>>, vector<4x8x1xf32>,
    %c0_i32_35 = arith.constant 0 : i32
    %36 = arith.cmpi eq, %arg1, %c0_i32_35 : i32
    %37 = arith.extui %36 : i1 to i32
    %c0_i32_36 = arith.constant 0 : i32
    %38 = arith.cmpi ne, %37, %c0_i32_36 : i32
    scf.if %38 {
      %c0_37 = arith.constant 0 : index
      %c0_38 = arith.constant 0 : index
      %c0_39 = arith.constant 0 : index
      %39 = vector.load %arg8[%c0_37, %c0_38, %c0_39] : memref<4x8x1xf32, #tpu.memory_space<vmem>>, vector<4x8x1xf32>
      %40 = tpu.reciprocal %39 {approx = true} : vector<4x8x1xf32> -> vector<4x8x1xf32>
      %41 = arith.mulf %39, %40 : vector<4x8x1xf32>
      %cst_40 = arith.constant 2.000000e+00 : f32
      %42 = vector.broadcast %cst_40 : f32 to vector<4x8x1xf32>
      %43 = arith.subf %42, %41 : vector<4x8x1xf32>
      %44 = arith.mulf %40, %43 : vector<4x8x1xf32>
      %c0_41 = arith.constant 0 : index
      %c0_42 = arith.constant 0 : index
      %c0_43 = arith.constant 0 : index
      %45 = vector.load %arg9[%c0_41, %c0_42, %c0_43] : memref<4x8x32xf32, #tpu.memory_space<vmem>>, vector<4x8x32xf32>
      %46 = vector.broadcast %44 : vector<4x8x1xf32> to vector<4x8x32xf32>
      %47 = arith.mulf %45, %46 : vector<4x8x32xf32>
      %c0_44 = arith.constant 0 : index
      %c0_45 = arith.constant 0 : index
      %c0_46 = arith.constant 0 : index
      %48 = vector.load %arg6[%c0_44, %c0_45, %c0_46] : memref<4x8x32xf32, #tpu.memory_space<vmem>>, vector<4x8x32xf32>
      tpu.vector_store %arg6[%c0_44, %c0_45, %c0_46], %47 {strides = array<i32>} : memref<4x8x32xf32, #tpu.memory_space<vmem>>, vector<4x8x32xf32>,
    } else {
    }
    return
  }
  func.func @transform_0(%arg0: i32, %arg1: i32) -> (i32, i32, i32) {
    %c0_i32 = arith.constant 0 : i32
    %c0_i32_0 = arith.constant 0 : i32
    %c0_i32_1 = arith.constant 0 : i32
    return %arg0, %c0_i32, %c0_i32_0 : i32, i32, i32
  }
  func.func @transform_1(%arg0: i32, %arg1: i32) -> (i32, i32, i32) {
    %c0_i32 = arith.constant 0 : i32
    %c0_i32_0 = arith.constant 0 : i32
    return %arg0, %arg1, %c0_i32 : i32, i32, i32
  }
  func.func @transform_2(%arg0: i32, %arg1: i32) -> (i32, i32, i32) {
    %c0_i32 = arith.constant 0 : i32
    %c0_i32_0 = arith.constant 0 : i32
    return %arg0, %arg1, %c0_i32 : i32, i32, i32
  }
  func.func @transform_3(%arg0: i32, %arg1: i32) -> (i32, i32, i32) {
    %c0_i32 = arith.constant 0 : i32
    %c0_i32_0 = arith.constant 0 : i32
    return %arg0, %c0_i32, %arg1 : i32, i32, i32
  }
  func.func @transform_4(%arg0: i32, %arg1: i32) -> (i32, i32, i32) {
    %c0_i32 = arith.constant 0 : i32
    %c0_i32_0 = arith.constant 0 : i32
    %c0_i32_1 = arith.constant 0 : i32
    return %arg0, %c0_i32, %c0_i32_0 : i32, i32, i32
  }
}

</mosaic_0001>

<bundles_post_ra>
// kernel: scaled_dot_product_de_attention.1
= control target key start
LH: loop header
LB: loop body
LE: loop exit
PB: predicated region body
PF: predicated region fallthrough
CT: control target
= control target key end

     0   :  { %s2089_s0 = inlined_call_operand.hbm [shape: f32[8,8,32], index: 0, kind: input, shape index: {}]   ;;  %s2090_s1 = inlined_call_operand.hbm [shape: f32[8,8,32], index: 1, kind: input, shape index: {}]   ;;  %s2091_s2 = inlined_call_operand.hbm [shape: f32[8,8,32], index: 2, kind: input, shape index: {}]   ;;  %s2092_s3 = inlined_call_operand.vmem [shape: s8[8,8,8], index: 3, kind: input, shape index: {}]   ;;  %s2093_s4 = inlined_call_operand.hbm [shape: f32[8,8,32], index: 4, kind: output, shape index: {}]  }
   0x1   :  { %2100 = sst [smem:[#allocation19_spill]] %s2090_s1 }
   0x2   :  { %9 = vsyncpa [#allocation6], 0 }
   0x3   :  { %11 = vsyncpa [#allocation6 + $0x1], 0 }
   0x4   :  { %12 = vsyncpa [#allocation9], 0 }
   0x5   :  { %14 = vsyncpa [#allocation9 + $0x1], 0 }
   0x6   :  { %15 = vsyncpa [#allocation7], 0 }
   0x7   :  { %17 = vsyncpa [#allocation7 + $0x1], 0  ;;  %s1761_s15 = smov 0   ;;  %s1763_s16 = smov 0  }
   0x8   :  { %s1765_s17 = smov 0   ;;  %s1767_s18 = smov 0  }
   0x9   :  { %s1769_s19 = smov 0   ;;  %s1771_s20 = smov 0  }
   0xa LB: > { %2101 = sst [smem:[#allocation15_spill]] %s1718_s19  ;;  %s1792_s21 = sadd.s32 4294967295, %s1722_s20   ;;  %s1722_s20 = sphi %s1771_s20, %s23_s20   ;;  %s1718_s19 = sphi %s1769_s19, %s2118_s19   ;;  %s1714_s18 = sphi %s1767_s18, %s2117_s18   ;;  %s1710_s17 = sphi %s1765_s17, %s2121_s17   ;;  %s1706_s16 = sphi %s1763_s16, %s2120_s16   ;;  %s1702_s15 = sphi %s1761_s15, %s2119_s15  }
   0xb   : > { %s1352_s22 = sadd.s32 4294967294, %s1722_s20   ;;  %s35_s23 = sadd.s32 1, %s1718_s19 }
   0xc   : > { %s42_s24 = sadd.s32 1, %s1710_s17  ;;  %p37_p0 = scmp.ge.s32.totalorder %s35_s23, 2 }
   0xd   : > { %p49_p1 = scmp.ne.s32.totalorder %s1710_s17, %s1706_s16  ;;  %p50_p2 = scmp.eq.s32.totalorder %s1722_s20, 0 }
   0xe   : > { %p55_p3 = scmp.ne.s32.totalorder %s1706_s16, %s1702_s15  ;;  %s2123_s23 = smov (%p37_p0, %s35_s23), 0 }
   0xf   : > { %2102 = sst [smem:[#allocation16_spill]] %s2123_s23  ;;  %p1804_p4 = por %p50_p2, %p49_p1 }
  0x10   : > { %p56_p5 = scmp.eq.s32.totalorder %s1792_s21, 0  ;;  %s39_s26 = ssub.s32 %s1718_s19, %s2123_s23 }
  0x11   : > { %p163_p6 = scmp.eq.s32.totalorder %s1792_s21, 1  ;;  %p40_p7 = scmp.eq.s32.totalorder %s39_s26, 0 }
  0x12   : > { %p1812_p8 = por %p56_p5, %p55_p3  ;;  %p169_p10 = scmp.eq.s32.totalorder %s1352_s22, 1 }
  0x13   : > { %p1816_p9 = por %p163_p6, %p49_p1  ;;  %p1470_p13 = scmp.lt.s32.totalorder %s1722_s20, 2 }
  0x14   : > { %s1821_s29 = scalar_select %p40_p7, %s1710_s17, %s42_s24  }
  0x15   : > { %p1823_p11 = por %p169_p10, %p55_p3  ;;  %s2094_s5 = sand.u32 1, %s1710_s17  }
  0x16   : > { %2106 = sst [smem:[#allocation17_spill]] %s1821_s29  ;;  %s1832_s6 = sshll.u32 %s2094_s5, 5 }
  0x17   : > { %s2107_s30 = scalar_select %p1823_p11, 1, 0 }
  0x18   : > { %s1835_s7 = sshll.u32 %s1718_s19, 9  ;;  %p1839_p0 = pnand %p1470_p13, %p1804_p4 }
  0x19   : > { %2108 = sst [smem:[#allocation18_spill]] %s2107_s30  ;;  %s210_s9 = sand.u32 1, %s1722_s20  }
  0x1a   : > { %s2110_s1 = sld [smem:[#allocation19_spill]]  ;;  %s214_s13 = scalar_lea.vmem [#allocation8], %s1832_s6 }
  0x1b   : > { %s222_s14 = sshll.u32 %s214_s13, 4  ;;  %p1364_p1 = scmp.ge.s32.totalorder %s1722_s20, 1  ;;  %s223_s14 = int_to_ptr.vmem [resolvable:$true] %s222_s14 }
  0x1c   : > { %p264_p2 = scmp.lt.s32.totalorder %s1722_s20, 3  ;;  %s1851_s22 = scalar_lea.sflag [#allocation9], %s210_s9 }
  0x1d   : > { %p1556_p3 = pneg %p1839_p0  ;;  %s1567_s24 = scalar_lea.vmem %s223_s14, 512 }
  0x1e   : > { %p1568_p4 = scmp.ne.s32.totalorder %s223_s14, %s1567_s24  ;;  %s1724_s25 = smov [#allocation8]  }
  0x1f   : > { %s1572_s26 = sshll.u32 %s1724_s25, 4  ;;  %s1573_s26 = int_to_ptr.vmem [resolvable:$false] %s1572_s26 }
  0x20   : > { %s221_s12 = scalar_lea.hbm %s2110_s1, %s1835_s7  ;;  %p1570_p5 = pnand %p1568_p4, %p1556_p3 }
  0x21   : > { %s1574_s10 = scalar_lea.vmem %s1573_s26, 1024  ;;  %p1575_p7 = scmp.lt.s32.totalorder %s223_s14, %s1573_s26 }
  0x22   : > { %p1571_p6 = pneg %p1570_p5  ;;  %p1576_p10 = scmp.lt.s32.totalorder %s1574_s10, %s1567_s24 }
  0x24   : > { %p1577_p13 = por %p1576_p10, %p1575_p7 }
  0x26   : > { %p1578_p12 = pnand %p1577_p13, %p1571_p6 }
  0x28   : > { %1581 = shalt.err (!%p1578_p12)
}
  0x29   : > { %s2098_s11 = smov 128   ;;  %s1726_s9 = smov 8  }
  0x2a   : > { %1462 = dma.hbm_to_vmem [thread:$0]  (!%p1839_p0), %s221_s12, 512, %s223_s14, %s1851_s22, %s2098_s11, %s2098_s11, %s1726_s9  }
  0x2b   : > { %p1868_p4 = pnand %p1364_p1, %p264_p2  ;;  %s199_s26 = scalar_lea.hbm %s2089_s0, %s1835_s7 }
  0x2c   : > { %s193_s10 = scalar_lea.vmem [#allocation5], %s1832_s6  ;;  %s243_s19 = scalar_lea.hbm %s2091_s2, %s1835_s7 }
  0x2d   : > { %s200_s5 = sshll.u32 %s193_s10, 4  ;;  %s2112_s29 = sand.u32 1, %s1710_s17   ;;  %s201_s5 = int_to_ptr.vmem [resolvable:$true] %s200_s5 }
  0x2e   : > { %s190_s30 = scalar_lea.sflag [#allocation6], %s2112_s29  ;;  %s1595_s12 = scalar_lea.vmem %s201_s5, 512 }
  0x2f   : > { %p1596_p12 = scmp.ne.s32.totalorder %s201_s5, %s1595_s12  ;;  %s1727_s14 = smov [#allocation5]  }
  0x30   : > { %s1600_s11 = sshll.u32 %s1727_s14, 4  ;;  %s1601_s11 = int_to_ptr.vmem [resolvable:$false] %s1600_s11 }
  0x31   : > { %p1598_p1 = pnand %p1596_p12, %p1556_p3  ;;  %s1602_s24 = scalar_lea.vmem %s1601_s11, 1024 }
  0x32   : > { %p1603_p5 = scmp.lt.s32.totalorder %s201_s5, %s1601_s11  ;;  %p1604_p6 = scmp.lt.s32.totalorder %s1602_s24, %s1595_s12 }
  0x33   : > { %p1599_p2 = pneg %p1598_p1 }
  0x34   : > { %p1605_p7 = por %p1604_p6, %p1603_p5 }
  0x36   : > { %p1606_p10 = pnand %p1605_p7, %p1599_p2 }
  0x38   : > { %1609 = shalt.err (!%p1606_p10)
}
  0x39   : > { %s2113_s1 = smov 128   ;;  %s236_s23 = scalar_lea.vmem [#allocation10], %s1832_s6 }
  0x3a   : > { %1459 = dma.hbm_to_vmem [thread:$0]  (!%p1839_p0), %s199_s26, 512, %s201_s5, %s190_s30, %s2113_s1, %s2113_s1, %s1726_s9  }
  0x3b   : > { %s244_s29 = sshll.u32 %s236_s23, 4  ;;  %s1728_s11 = smov [#allocation10]   ;;  %s245_s29 = int_to_ptr.vmem [resolvable:$true] %s244_s29 }
  0x3c   : > { %s1623_s25 = scalar_lea.vmem %s245_s29, 512  ;;  %s1628_s10 = sshll.u32 %s1728_s11, 4  ;;  %s1629_s10 = int_to_ptr.vmem [resolvable:$false] %s1628_s10 }
  0x3d   : > { %p1624_p13 = scmp.ne.s32.totalorder %s245_s29, %s1623_s25  ;;  %s1630_s12 = scalar_lea.vmem %s1629_s10, 1024 }
  0x3e   : > { %p1631_p2 = scmp.lt.s32.totalorder %s245_s29, %s1629_s10  ;;  %p1632_p5 = scmp.lt.s32.totalorder %s1630_s12, %s1623_s25 }
  0x3f   : > { %p1626_p12 = pnand %p1624_p13, %p1556_p3 }
  0x40   : > { %p1633_p6 = por %p1632_p5, %p1631_p2 }
  0x41   : > { %p1627_p1 = pneg %p1626_p12 }
  0x43   : > { %p1634_p7 = pnand %p1633_p6, %p1627_p1 }
  0x45   : > { %1637 = shalt.err (!%p1634_p7)
}
  0x46   : > { %1465 = dma.hbm_to_vmem [thread:$0]  (!%p1839_p0), %s243_s19, 512, %s245_s29, %s1851_s22, %s2113_s1, %s2113_s1, %s1726_s9  }
  0x47   : > { %268 = sbr.rel (%p1868_p4) target bundleno = 884 (0x374), region = 36  ;;  %s1909_s6 = sand.u32 (!%p1868_p4), 1, %s1706_s16  }
  0x48   : > { %s1912_s8 = sshll.u32 (!%p1868_p4), %s1909_s6, 5  ;;  %s271_s26 = scalar_lea.sflag (!%p1868_p4), [#allocation6], %s1909_s6 }
  0x49   : > { %s1916_s14 = scalar_lea.vmem (!%p1868_p4), [#allocation5], %s1912_s8 }
  0x4c   : > { %1689 = dma.done.wait (%p1812_p8), %s271_s26, 512  }
  0x4d   : > { %1691 = vsyncadd (%p1812_p8), %s271_s26, 4294966784  ;;  %s279_s19 = sand.u32 1, %s1792_s21   ;;  %s283_s22 = scalar_lea.vmem [#allocation8], %s1912_s8 }
  0x4e   : > { %s280_s7 = scalar_lea.sflag [#allocation9], %s279_s19 }
  0x4f   : > { %1693 = dma.done.wait (%p1812_p8), %s280_s7, 1024  }
  0x50   : > { %1695 = vsyncadd (%p1812_p8), %s280_s7, 4294966272  ;;  %vm363_vm0 = vcmask 261120   ;;  %v1729_v0 = vmov 0.0   ;;  %vm1730_vm1 = vmmov 0   ;;  %v376_v1 = vld [vmem:[%s283_s22] sm:$0xff]  ;;  %v377_v2 = vld [vmem:[%s283_s22 + $0x8] sm:$0xff] }
  0x51   : > { %1408 = vmatprep.subr.mxu0 %v1729_v0  ;;  %364 = vst.msk [vmem:[#allocation4] sm:$0xff] %vm363_vm0, %v1729_v0  ;;  %365 = vst.msk [vmem:[#allocation4 + $0x8] sm:$0xff] %vm363_vm0, %v1729_v0  ;;  %1413 = vmatprep.subr.mxu1 %v1729_v0  ;;  %v368_v3 = vld [vmem:[%s1916_s14] sm:$0xff]  ;;  %v369_v5 = vld [vmem:[%s1916_s14 + $0x8] sm:$0xff]  ;;  %v1731_v13 = vmov 0   ;;  %vm354_vm2 = vcmask 7168  }
  0x52   : > { %366 = vst.msk [vmem:[#allocation4 + $0x10] sm:$0xff] %vm363_vm0, %v1729_v0  ;;  %367 = vst.msk [vmem:[#allocation4 + $0x18] sm:$0xff] %vm363_vm0, %v1729_v0  ;;  %1410 = vmatprep.mubr.msk.f32.mxu0 %vm1730_vm1, %v1729_v0  ;;  %1415 = vmatprep.mubr.msk.f32.mxu1 %vm1730_vm1, %v1729_v0  ;;  %v372_v4 = vmul.f32 0.17677669, %v368_v3  ;;  %v370_v6 = vld [vmem:[%s1916_s14 + $0x10] sm:$0xff]  ;;  %v371_v9 = vld [vmem:[%s1916_s14 + $0x18] sm:$0xff] }
  0x53   : > { %1409 = vmatpush3.xpose.msk.msra.mxu0 %vm363_vm0, %v376_v1  ;;  %1414 = vmatpush3.xpose.msk.msra.mxu1 %vm363_vm0, %v377_v2  ;;  %v373_v7 = vmul.f32 0.17677669, %v369_v5  ;;  %v378_v8 = vld [vmem:[%s283_s22 + $0x10] sm:$0xff]  ;;  %v379_v10 = vld [vmem:[%s283_s22 + $0x18] sm:$0xff]  ;;  %v374_v11 = vmul.f32 0.17677669, %v370_v6 }
  0x54   : > { %1418 = vmatprep.subr.mxu0 %v1729_v0  ;;  %1423 = vmatprep.subr.mxu1 %v1729_v0  ;;  %v375_v12 = vmul.f32 0.17677669, %v371_v9  ;;  %v1732_v14 = vmov -inf   ;;  %359 = vst.msk [vmem:[#allocation3] sm:$0xff] %vm354_vm2, %v1729_v0  ;;  %360 = vst.msk [vmem:[#allocation3 + $0x8] sm:$0xff] %vm354_vm2, %v1729_v0  ;;  %s1369_s21 = sshll.u32 %s1714_s18, 2 }
  0x55   : > { %1528 = vset.pattern.permute.xlu0 %v1731_v13  ;;  %1529 = vset.pattern.permute.xlu1 %v1731_v13  ;;  %355 = vst.msk [vmem:[#allocation2] sm:$0xff] %vm354_vm2, %v1732_v14  ;;  %356 = vst.msk [vmem:[#allocation2 + $0x8] sm:$0xff] %vm354_vm2, %v1732_v14  ;;  %p339_p8 = scmp.lt.s32.totalorder %s1369_s21, 7  ;;  %vm713_vm9 = vcmask 64512   ;;  %s292_s1 = scalar_lea.vmem [#allocation10], %s1912_s8 }
  0x56   : > { %1411 = vmatmul.mubr.msk.f32.vlgmr.msra.gmra.mxu0 %vm363_vm0, %v372_v4  ;;  %1416 = vmatmul.mubr.msk.f32.vlgmr.msra.gmra.mxu1 %vm363_vm0, %v373_v7  ;;  %357 = vst.msk [vmem:[#allocation2 + $0x10] sm:$0xff] %vm354_vm2, %v1732_v14  ;;  %358 = vst.msk [vmem:[#allocation2 + $0x18] sm:$0xff] %vm354_vm2, %v1732_v14  ;;  %v831_v59 = vld [vmem:[%s292_s1] sm:$0xff]  ;;  %v832_v60 = vld [vmem:[%s292_s1 + $0x8] sm:$0xff]  ;;  %s334_s23 = scalar_lea.vmem [#allocation11], %s1912_s8  ;;  %s1391_s25 = sshll.u32 %s1714_s18, 9 }
  0x57   : > { %1419 = vmatpush3.xpose.msk.msra.mxu0 %vm363_vm0, %v378_v8  ;;  %1420 = vmatprep.mubr.msk.f32.mxu0 %vm1730_vm1, %v1729_v0  ;;  %361 = vst.msk [vmem:[#allocation3 + $0x10] sm:$0xff] %vm354_vm2, %v1729_v0  ;;  %362 = vst.msk [vmem:[#allocation3 + $0x18] sm:$0xff] %vm354_vm2, %v1729_v0  ;;  %s2125_s21 = smov (!%p339_p8, %s1369_s21), 7  ;;  %s1208_s29 = sshll.u32 %s334_s23, 4  ;;  %s2034_s29 = int_to_ptr.vmem [resolvable:$true] %s1208_s29 }
  0x58   : > { %1424 = vmatpush3.xpose.msk.msra.mxu1 %vm363_vm0, %v379_v10  ;;  %1425 = vmatprep.mubr.msk.f32.mxu1 %vm1730_vm1, %v1729_v0  ;;  %s1370_s27 = sshll.u32 %s2125_s21, 1  ;;  %v833_v10 = vld [vmem:[%s292_s1 + $0x10] sm:$0xff]  ;;  %s2040_s12 = scalar_lea.hbm %s2093_s4, %s1391_s25 }
  0x59   : > { %1428 = vmatprep.subr.mxu0 %v1729_v0  ;;  %1433 = vmatprep.subr.mxu1 %v1729_v0  ;;  %s345_s24 = scalar_lea.vmem %s2092_s3, %s1370_s27  ;;  %s1195_s30 = scalar_lea.sflag [#allocation7], %s1909_s6 }
  0x5a   : > { %1421 = vmatmul.mubr.msk.f32.vlgmr.msra.gmra.mxu0 %vm363_vm0, %v374_v11  ;;  %v685_v15 = vld [vmem:[%s345_s24] sm:$0x3]  ;;  %v686_v16 = vld [vmem:[%s345_s24 + $0x2] sm:$0x3]  ;;  %v687_v17 = vld [vmem:[%s345_s24 + $0x4] sm:$0x3] }
  0x5b   : > { %1426 = vmatmul.mubr.msk.f32.vlgmr.msra.gmra.mxu1 %vm363_vm0, %v375_v12  ;;  %1430 = vmatprep.mubr.msk.f32.mxu0 %vm1730_vm1, %v1729_v0  ;;  %vm689_vm3 = vnez %v685_v15  ;;  %vm690_vm4 = vnez %v686_v16  ;;  %v688_v18 = vld [vmem:[%s345_s24 + $0x6] sm:$0x3]  ;;  %vm691_vm5 = vnez %v687_v17  ;;  %s1638_s5 = scalar_lea.vmem %s2034_s29, 512  ;;  %s1733_s18 = smov [#allocation11]  }
  0x5c   : > { %1435 = vmatprep.mubr.msk.f32.mxu1 %vm1730_vm1, %v1729_v0  ;;  %v693_v19 = vsel %vm689_vm3, 16843009, %v1731_v13  ;;  %v694_v20 = vsel %vm690_vm4, 16843009, %v1731_v13  ;;  %vm692_vm6 = vnez %v688_v18  ;;  %v695_v23 = vsel %vm691_vm5, 16843009, %v1731_v13  ;;  %1429 = vmatpush3.msra.mxu0 %v831_v59  ;;  %p1639_p0 = scmp.ne.s32.totalorder %s2034_s29, %s1638_s5 }
  0x5d   : > { %v697_v21 = vunpack.c.0.s8 %v693_v19  ;;  %v698_v22 = vunpack.c.0.s8 %v694_v20  ;;  %v696_v24 = vsel %vm692_vm6, 16843009, %v1731_v13  ;;  %v699_v25 = vunpack.c.0.s8 %v695_v23  ;;  %v1986_v43 = vld [vmem:[#allocation2] sm:$0xff]  ;;  %v710_v46 = vld [vmem:[#allocation2 + $0x8] sm:$0xff]  ;;  %v1991_v47 = vld [vmem:[#allocation2 + $0x10] sm:$0xff]  ;;  %1438 = vmatprep.subr.mxu0 %v1729_v0  ;;  %1434 = vmatpush3.msra.mxu1 %v832_v60  ;;  %s1642_s8 = sshll.u32 %s1733_s18, 4  ;;  %s1643_s8 = int_to_ptr.vmem [resolvable:$false] %s1642_s8 }
  0x5e   : > { %v700_v26 = vunpack.c.0.s8 %v696_v24  ;;  %v1999_v53 = vld [vmem:[#allocation2 + $0x18] sm:$0xff]  ;;  %1443 = vmatprep.subr.mxu1 %v1729_v0  ;;  %p1640_p3 = pnand %p1639_p0, %p1816_p9  ;;  %s1644_s26 = scalar_lea.vmem %s1643_s8, 1024 }
  0x5f   : > { %vm701_vm7 = vcmp.ne.s32.totalorder %v697_v21, 0  ;;  %vm702_vm8 = vcmp.ne.s32.totalorder %v698_v22, 0  ;;  %vm703_vm10 = vcmp.ne.s32.totalorder %v699_v25, 0  ;;  %v834_v13 = vld [vmem:[%s292_s1 + $0x18] sm:$0xff]  ;;  %p1645_p10 = scmp.lt.s32.totalorder %s2034_s29, %s1643_s8  ;;  %p1646_p13 = scmp.lt.s32.totalorder %s1644_s26, %s1638_s5 }
  0x60   : > { %vm704_vm11 = vcmp.ne.s32.totalorder %v700_v26, 0  ;;  %p1641_p4 = pneg %p1640_p3 }
  0x61   : > { %p1647_p12 = por %p1646_p13, %p1645_p10 }
  0x63   : > { %p1648_p1 = pnand %p1647_p12, %p1641_p4 }
 0x116   : > { %v453_v27 = vpop.f32.mrf.mxu0  ;;  %v529_v28 = vpop.f32.mrf.mxu1 }
 0x117   : > { %v705_v29 = vsel %vm701_vm7, -1e+09, %v453_v27  ;;  %v706_v30 = vsel %vm702_vm8, -1e+09, %v529_v28  ;;  %v774_v27 = vld [vmem:[#allocation3] sm:$0xff] }
 0x118   : > { %v1412_v31 = vpop.f32.mrf.mxu0  ;;  %v714_v32 = vsel %vm713_vm9, %v705_v29, -inf  ;;  %v1417_v33 = vpop.f32.mrf.mxu1  ;;  %v717_v35 = vsel %vm713_vm9, %v706_v30, -inf }
 0x119   : > { %715 = vmax.xlane.f32.xlu0 %v714_v32 }
 0x11a   : > { %v605_v34 = vpop.f32.mrf.mxu0 }
 0x11b   : > { %v707_v36 = vsel %vm703_vm10, -1e+09, %v605_v34  ;;  %v681_v37 = vpop.f32.mrf.mxu1  ;;  %v776_v34 = vld [vmem:[#allocation3 + $0x10] sm:$0xff] }
 0x11c   : > { %v1422_v38 = vpop.f32.mrf.mxu0  ;;  %v708_v39 = vsel %vm704_vm11, -1e+09, %v681_v37  ;;  %v720_v40 = vsel %vm713_vm9, %v707_v36, -inf }
 0x11d   : > { %718 = vmax.xlane.f32.xlu0 %v717_v35  ;;  %721 = vmax.xlane.f32.xlu1 %v720_v40  ;;  %v1427_v41 = vpop.f32.mrf.mxu1  ;;  %v723_v42 = vsel %vm713_vm9, %v708_v39, -inf  ;;  %v777_v38 = vld [vmem:[#allocation3 + $0x18] sm:$0xff] }
 0x121   : > { %724 = vmax.xlane.f32.xlu1 %v723_v42 }
 0x1a2   : > { %v716_v44 = vpop.xlane.xlu0 %715 }
 0x1a3   : > { %v1989_v45 = vmax.f32 %v1986_v43, %v716_v44 }
 0x1a5   : > { %v730_v48 = vsub.f32 %v1986_v43, %v1989_v45  ;;  %1135 = vst.msk [vmem:[#allocation2] sm:$0xff] %vm354_vm2, %v1989_v45  ;;  %744 = vperm.xlu0 %1528, %v1989_v45  }
 0x1a6   : > { %v719_v49 = vpop.xlane.xlu0 %718  ;;  %v722_v50 = vpop.xlane.xlu1 %721 }
 0x1a7   : > { %v727_v51 = vmax.f32 %v710_v46, %v719_v49  ;;  %v728_v52 = vmax.f32 %v1991_v47, %v722_v50  ;;  %v734_v20 = vmul.f32 1.442695, %v730_v48 }
 0x1a9   : > { %v731_v54 = vsub.f32 %v710_v46, %v727_v51  ;;  %1136 = vst.msk [vmem:[#allocation2 + $0x8] sm:$0xff] %vm354_vm2, %v727_v51  ;;  %749 = vperm.xlu1 %1529, %v727_v51   ;;  %v732_v55 = vsub.f32 %v1991_v47, %v728_v52  ;;  %1137 = vst.msk [vmem:[#allocation2 + $0x10] sm:$0xff] %vm354_vm2, %v728_v52 }
 0x1aa   : > { %v725_v56 = vpop.xlane.xlu1 %724 }
 0x1ab   : > { %v729_v57 = vmax.f32 %v1999_v53, %v725_v56  ;;  %v736_v18 = vmul.f32 1.442695, %v731_v54  ;;  %v738_v22 = vmul.f32 1.442695, %v732_v55 }
 0x1ad   : > { %754 = vperm.xlu1 %1529, %v728_v52   ;;  %v733_v58 = vsub.f32 %v1999_v53, %v729_v57  ;;  %1138 = vst.msk [vmem:[#allocation2 + $0x18] sm:$0xff] %vm354_vm2, %v729_v57 }
 0x1af   : > { %v740_v23 = vmul.f32 1.442695, %v733_v58 }
 0x1b1   : > { %759 = vperm.xlu1 %1529, %v729_v57  }
 0x220   : > { %v745_v61 = vpop.permute.xlu0 %744 }
 0x221   : > { %v762_v62 = vsub.f32 %v705_v29, %v745_v61 }
 0x223   : > { %v766_v63 = vmul.f32 1.442695, %v762_v62 }
 0x224   : > { %v750_v1 = vpop.permute.xlu1 %749 }
 0x225   : > { %1530 = vpow2.f32 %v766_v63  ;;  %v763_v2 = vsub.f32 %v706_v30, %v750_v1  ;;  %v775_v30 = vld [vmem:[#allocation3 + $0x8] sm:$0xff]  ;;  %v803_v63 = vld [vmem:[#allocation4] sm:$0xff] }
 0x227   : > { %v768_v3 = vmul.f32 1.442695, %v763_v2 }
 0x228   : > { %v755_v4 = vpop.permute.xlu1 %754 }
 0x229   : > { %1532 = vpow2.f32 %v768_v3  ;;  %v764_v5 = vsub.f32 %v707_v36, %v755_v4  ;;  %v804_v3 = vld [vmem:[#allocation4 + $0x8] sm:$0xff] }
 0x22b   : > { %v770_v6 = vmul.f32 1.442695, %v764_v5 }
 0x22c   : > { %v760_v7 = vpop.permute.xlu1 %759 }
 0x22d   : > { %1534 = vpow2.f32 %v770_v6  ;;  %v765_v8 = vsub.f32 %v708_v39, %v760_v7 }
 0x22f   : > { %v772_v9 = vmul.f32 1.442695, %v765_v8 }
 0x231   : > { %1536 = vpow2.f32 %v772_v9 }
 0x232   : > { %v1531_v11 = vpop.eup %1530  ;;  %1538 = vpow2.f32 %v736_v18 }
 0x233   : > { %1431 = vmatmul.mubr.msk.f32.vlgmr.msra.gmra.mxu0 %vm713_vm9, %v1531_v11  ;;  %v782_v12 = vsel %vm713_vm9, %v1531_v11, 0.0  ;;  %1540 = vpow2.f32 %v734_v20 }
 0x234   : > { %783 = vadd.xlane.f32.xlu1 %v782_v12  ;;  %1439 = vmatpush3.msra.mxu0 %v833_v10  ;;  %1542 = vpow2.f32 %v738_v22  ;;  %v805_v10 = vld [vmem:[#allocation4 + $0x10] sm:$0xff] }
 0x235   : > { %1440 = vmatprep.mubr.msk.f32.mxu0 %vm1730_vm1, %v1729_v0  ;;  %1544 = vpow2.f32 %v740_v23 }
 0x236   : > { %v1533_v14 = vpop.eup %1532 }
 0x237   : > { %1436 = vmatmul.mubr.msk.f32.vlgmr.msra.gmra.mxu1 %vm713_vm9, %v1533_v14  ;;  %v785_v15 = vsel %vm713_vm9, %v1533_v14, 0.0 }
 0x238   : > { %786 = vadd.xlane.f32.xlu0 %v785_v15  ;;  %1444 = vmatpush3.msra.mxu1 %v834_v13  ;;  %v806_v15 = vld [vmem:[#allocation4 + $0x18] sm:$0xff] }
 0x239   : > { %1445 = vmatprep.mubr.msk.f32.mxu1 %vm1730_vm1, %v1729_v0 }
 0x23a   : > { %v1535_v16 = vpop.eup %1534 }
 0x23b   : > { %1441 = vmatmul.mubr.msk.f32.vlgmr.msra.gmra.mxu0 %vm713_vm9, %v1535_v16  ;;  %v788_v17 = vsel %vm713_vm9, %v1535_v16, 0.0 }
 0x23c   : > { %789 = vadd.xlane.f32.xlu1 %v788_v17 }
 0x23e   : > { %v1537_v19 = vpop.eup %1536 }
 0x23f   : > { %1446 = vmatmul.mubr.msk.f32.vlgmr.msra.gmra.mxu1 %vm713_vm9, %v1537_v19  ;;  %v791_v21 = vsel %vm713_vm9, %v1537_v19, 0.0  ;;  %v1539_v0 = vpop.eup %1538 }
 0x240   : > { %792 = vadd.xlane.f32.xlu1 %v791_v21  ;;  %v1541_v24 = vpop.eup %1540  ;;  %v779_v32 = vmul.f32 %v1539_v0, %v775_v30 }
 0x241   : > { %v1543_v25 = vpop.eup %1542  ;;  %v778_v28 = vmul.f32 %v1541_v24, %v774_v27 }
 0x242   : > { %v1545_v26 = vpop.eup %1544  ;;  %v780_v36 = vmul.f32 %v1543_v25, %v776_v34 }
 0x243   : > { %v781_v41 = vmul.f32 %v1545_v26, %v777_v38 }
 0x24e   : > { %814 = vperm.xlu0 %1528, %v1539_v0  }
 0x251   : > { %809 = vperm.xlu1 %1529, %v1541_v24  }
 0x255   : > { %819 = vperm.xlu1 %1529, %v1543_v25  }
 0x259   : > { %824 = vperm.xlu1 %1529, %v1545_v26  }
 0x2bd   : > { %v784_v29 = vpop.xlane.xlu1 %783 }
 0x2be   : > { %v794_v31 = vadd.f32 %v784_v29, %v778_v28 }
 0x2c0   : > { %799 = vst.msk [vmem:[#allocation3] sm:$0xff] %vm354_vm2, %v794_v31 }
 0x2c1   : > { %v787_v33 = vpop.xlane.xlu0 %786 }
 0x2c2   : > { %v795_v35 = vadd.f32 %v787_v33, %v779_v32 }
 0x2c4   : > { %800 = vst.msk [vmem:[#allocation3 + $0x8] sm:$0xff] %vm354_vm2, %v795_v35 }
 0x2c5   : > { %v790_v37 = vpop.xlane.xlu1 %789 }
 0x2c6   : > { %v796_v39 = vadd.f32 %v790_v37, %v780_v36 }
 0x2c7   : > { %v1142_v40 = vld [vmem:[#allocation3] sm:$0xff] }
 0x2c8   : > { %801 = vst.msk [vmem:[#allocation3 + $0x10] sm:$0xff] %vm354_vm2, %v796_v39  ;;  %1546 = vrcp.f32 %v1142_v40 }
 0x2c9   : > { %v793_v42 = vpop.xlane.xlu1 %792  ;;  %v815_v4 = vpop.permute.xlu0 %814 }
 0x2ca   : > { %v797_v43 = vadd.f32 %v793_v42, %v781_v41  ;;  %v828_v9 = vmul.f32 %v815_v4, %v804_v3 }
 0x2cb   : > { %v1143_v44 = vld [vmem:[#allocation3 + $0x8] sm:$0xff] }
 0x2cc   : > { %802 = vst.msk [vmem:[#allocation3 + $0x18] sm:$0xff] %vm354_vm2, %v797_v43  ;;  %1548 = vrcp.f32 %v1143_v44 }
 0x2cd   : > { %v810_v1 = vpop.permute.xlu1 %809 }
 0x2ce   : > { %v827_v2 = vmul.f32 %v810_v1, %v803_v63 }
 0x2cf   : > { %v1144_v45 = vld [vmem:[#allocation3 + $0x10] sm:$0xff] }
 0x2d0   : > { %1550 = vrcp.f32 %v1144_v45 }
 0x2d1   : > { %v820_v7 = vpop.permute.xlu1 %819 }
 0x2d2   : > { %v829_v14 = vmul.f32 %v820_v7, %v805_v10 }
 0x2d3   : > { %v1145_v46 = vld [vmem:[#allocation3 + $0x18] sm:$0xff] }
 0x2d4   : > { %1552 = vrcp.f32 %v1145_v46 }
 0x2d5   : > { %v1547_v47 = vpop.eup %1546  ;;  %v825_v16 = vpop.permute.xlu1 %824 }
 0x2d6   : > { %v1150_v48 = vmul.f32 %v1547_v47, %v1142_v40  ;;  %v830_v20 = vmul.f32 %v825_v16, %v806_v15 }
 0x2d8   : > { %v1154_v49 = vsub.f32 2.0, %v1150_v48 }
 0x2d9   : > { %v1549_v50 = vpop.eup %1548 }
 0x2da   : > { %v1158_v51 = vmul.f32 %v1547_v47, %v1154_v49  ;;  %v1151_v52 = vmul.f32 %v1549_v50, %v1143_v44 }
 0x2dc   : > { %1168 = vperm.xlu1 %1529, %v1158_v51   ;;  %v1155_v53 = vsub.f32 2.0, %v1151_v52 }
 0x2dd   : > { %v1551_v54 = vpop.eup %1550 }
 0x2de   : > { %v1159_v55 = vmul.f32 %v1549_v50, %v1155_v53  ;;  %v1152_v56 = vmul.f32 %v1551_v54, %v1144_v45 }
 0x2e0   : > { %1173 = vperm.xlu0 %1528, %v1159_v55   ;;  %v1156_v57 = vsub.f32 2.0, %v1152_v56 }
 0x2e1   : > { %v1553_v58 = vpop.eup %1552 }
 0x2e2   : > { %v1160_v59 = vmul.f32 %v1551_v54, %v1156_v57  ;;  %v1153_v60 = vmul.f32 %v1553_v58, %v1145_v46 }
 0x2e4   : > { %1178 = vperm.xlu1 %1529, %v1160_v59   ;;  %v1157_v61 = vsub.f32 2.0, %v1153_v60 }
 0x2e6   : > { %v1161_v62 = vmul.f32 %v1553_v58, %v1157_v61 }
 0x2e8   : > { %1183 = vperm.xlu0 %1528, %v1161_v62  }
 0x2f3   : > { %v904_v5 = vpop.f32.mrf.mxu0 }
 0x2f4   : > { %v1127_v6 = vadd.f32 %v904_v5, %v827_v2 }
 0x2f5   : > { %v1432_v8 = vpop.f32.mrf.mxu0 }
 0x2f6   : > { %1131 = vst.msk [vmem:[#allocation4] sm:$0xff] %vm363_vm0, %v1127_v6 }
 0x2f7   : > { %v977_v11 = vpop.f32.mrf.mxu1 }
 0x2f8   : > { %v1128_v12 = vadd.f32 %v977_v11, %v828_v9 }
 0x2f9   : > { %v1437_v13 = vpop.f32.mrf.mxu1 }
 0x2fa   : > { %1132 = vst.msk [vmem:[#allocation4 + $0x8] sm:$0xff] %vm363_vm0, %v1128_v12 }
 0x2fb   : > { %v1050_v17 = vpop.f32.mrf.mxu0 }
 0x2fc   : > { %v1129_v18 = vadd.f32 %v1050_v17, %v829_v14 }
 0x2fd   : > { %v1442_v19 = vpop.f32.mrf.mxu0  ;;  %v1162_v0 = vld [vmem:[#allocation4] sm:$0xff] }
 0x2fe   : > { %1133 = vst.msk [vmem:[#allocation4 + $0x10] sm:$0xff] %vm363_vm0, %v1129_v18 }
 0x2ff   : > { %v1123_v21 = vpop.f32.mrf.mxu1 }
 0x300   : > { %v1130_v22 = vadd.f32 %v1123_v21, %v830_v20 }
 0x301   : > { %v1447_v23 = vpop.f32.mrf.mxu1  ;;  %v1163_v26 = vld [vmem:[#allocation4 + $0x8] sm:$0xff] }
 0x302   : > { %1134 = vst.msk [vmem:[#allocation4 + $0x18] sm:$0xff] %vm363_vm0, %v1130_v22 }
 0x305   : > { %v1164_v29 = vld [vmem:[#allocation4 + $0x10] sm:$0xff] }
 0x309   : > { %v1165_v33 = vld [vmem:[#allocation4 + $0x18] sm:$0xff] }
 0x357   : > { %v1169_v24 = vpop.permute.xlu1 %1168 }
 0x358   : > { %v1186_v25 = vmul.f32 %v1169_v24, %v1162_v0 }
 0x35a   : > { %1190 = vst.msk [vmem:[%s334_s23] sm:$0xff] %vm363_vm0, %v1186_v25 }
 0x35b   : > { %v1174_v27 = vpop.permute.xlu0 %1173 }
 0x35c   : > { %v1187_v28 = vmul.f32 %v1174_v27, %v1163_v26 }
 0x35e   : > { %1191 = vst.msk [vmem:[%s334_s23 + $0x8] sm:$0xff] %vm363_vm0, %v1187_v28 }
 0x35f   : > { %v1179_v30 = vpop.permute.xlu1 %1178 }
 0x360   : > { %v1188_v31 = vmul.f32 %v1179_v30, %v1164_v29 }
 0x362   : > { %1192 = vst.msk [vmem:[%s334_s23 + $0x10] sm:$0xff] %vm363_vm0, %v1188_v31 }
 0x363   : > { %v1184_v32 = vpop.permute.xlu0 %1183 }
 0x364   : > { %v1189_v34 = vmul.f32 %v1184_v32, %v1165_v33 }
 0x366   : > { %1193 = vst.msk [vmem:[%s334_s23 + $0x18] sm:$0xff] %vm363_vm0, %v1189_v34 }
 0x367   : > { %1651 = shalt.err (!%p1648_p1)
}
 0x368   : > { %s1652_s14 = scalar_lea.hbm %s2040_s12, 512  ;;  %s1656_s22 = scalar_lea.hbm %s2093_s4, 1024 }
 0x369   : > { %p1653_p2 = scmp.ne.s32.totalorder %s2040_s12, %s1652_s14  ;;  %p1657_p7 = scmp.lt.s32.totalorder %s2040_s12, %s2093_s4 }
 0x36a   : > { %p1658_p8 = scmp.lt.s32.totalorder %s1656_s22, %s1652_s14 }
 0x36b   : > { %p1654_p5 = pnand %p1653_p2, %p1816_p9 }
 0x36c   : > { %p1659_p0 = por %p1658_p8, %p1657_p7 }
 0x36d   : > { %p1655_p6 = pneg %p1654_p5 }
 0x36f   : > { %p1660_p3 = pnand %p1659_p0, %p1655_p6 }
 0x371   : > { %1663 = shalt.err (!%p1660_p3)
}
 0x372   : > { %s1734_s9 = smov 128   ;;  %s1735_s13 = smov 8  }
 0x373   : > { %1454 = dma.vmem_to_hbm [thread:$0]  (%p1816_p9), %s2034_s29, 512, %s2040_s12, %s1195_s30, %s1734_s9, %s1734_s9, %s1735_s13  }
 0x374 PF: > { %s1223_s1 = sand.u32 1, %s1702_s15   ;;  %p2115_p4 = scmp.ge.s32.totalorder %s1722_s20, 2 }
 0x375   : > { %s1224_s23 = scalar_lea.sflag [#allocation7], %s1223_s1 }
 0x376   : > { %p1467_p10 = pnand %p2115_p4, %p1823_p11 }
 0x378   : > { %p1468_p13 = pneg %p1467_p10 }
 0x37a   : > { %1697 = dma.done.wait (%p1468_p13), %s1224_s23, 512  }
 0x37b   : > { %1699 = vsyncadd (%p1468_p13), %s1224_s23, 4294966784  ;;  %s23_s20 = sadd.s32 1, %s1722_s20   ;;  %s2116_s28 = sld [smem:[#allocation17_spill]] }
 0x37c   : > { %p20_p12 = scmp.ge.s32.totalorder %s23_s20, 4   ;;  %s2117_s18 = sld [smem:[#allocation15_spill]] }
 0x37d   : > { %s2118_s19 = sld [smem:[#allocation16_spill]]  ;;  %s2119_s15 = smov %s1706_s16 }
 0x37e   : > { %s2120_s16 = smov %s1710_s17  ;;  %22 = sbr.rel (!%p20_p12) target bundleno = 10 (0xa), region = 116 }
 0x381   : > { %s2121_s17 = smov %s2116_s28 }
 0x383   :  { %1229 = vsyncpa [#allocation6], 1 }
 0x384   :  { %1231 = vsyncpa [#allocation6 + $0x1], 1 }
 0x385   :  { %1232 = vsyncpa [#allocation9], 1 }
 0x386   :  { %1234 = vsyncpa [#allocation9 + $0x1], 1 }
 0x387   :  { %1235 = vsyncpa [#allocation7], 1 }
 0x388   :  { %1237 = vsyncpa [#allocation7 + $0x1], 1 }

</bundles_post_ra>
